<compile_context>
chip_gen: v5e
topology: v5e:2x2
jax: 0.10.0
libtpu: 0.0.40
codegen_flags: <defaults>
</compile_context>

<pallas_src>
import functools

import jax
import jax.numpy as jnp
from jax.experimental import pallas as pl
from jax.experimental.pallas import tpu as pltpu


# ----------------------------------------------------------------------------
# Kernel
# ----------------------------------------------------------------------------
def _sft_kernel(feat_ref, cond_ref,
                w0_ref, b0_ref,           # fused stage-0: [scale; shift]
                ws1_ref, bs1p_ref,        # scale stage-1 (bias has +1 folded in)
                wh1_ref, bh1_ref,         # shift stage-1
                out_ref, *, n_cond, slope=0.1):
    # Blocks: feat (n_feat, t_hw), cond (n_cond, t_hw) — pixels on lanes.
    cond = cond_ref[...]
    feat = feat_ref[...]

    # Fused stage-0 for both branches: (2*n_cond, n_cond) @ (n_cond, t_hw).
    a0 = jnp.dot(w0_ref[...], cond, preferred_element_type=jnp.float32)
    a0 = a0 + b0_ref[...]                         # bias broadcasts over lanes
    a0 = jnp.where(a0 >= 0, a0, slope * a0)       # one leaky_relu, both branches
    a0 = a0.astype(cond.dtype)                    # back to I/O dtype for MXU

    s0 = a0[:n_cond]                              # scale-branch activation
    h0 = a0[n_cond:]                              # shift-branch activation

    # Stage-1 per branch: (n_feat, n_cond) @ (n_cond, t_hw).
    scale = jnp.dot(ws1_ref[...], s0, preferred_element_type=jnp.float32)
    scale = scale + bs1p_ref[...]                 # (+1 already folded into bias)
    shift = jnp.dot(wh1_ref[...], h0, preferred_element_type=jnp.float32)
    shift = shift + bh1_ref[...]

    out = feat.astype(jnp.float32) * scale + shift
    out_ref[...] = out.astype(out_ref.dtype)


# ----------------------------------------------------------------------------
# Wrapper
# ----------------------------------------------------------------------------
def _pick_t_hw(hw, cap=2048):
    """Largest spatial tile: full extent if small, else a 128-multiple divisor."""
    if hw <= cap:
        return hw
    for t in range(cap - cap % 128, 0, -128):
        if hw % t == 0:
            return t
    return hw  # fallback: single big block (always legal: equals full dim)


def pack_params(params, dtype=jnp.float32):
    """PyTorch-style params -> kernel params.

    params = (ws0, bs0, ws1, bs1, wh0, bh0, wh1, bh1) with conv weights shaped
    (out, in) (i.e. torch (out, in, 1, 1) squeezed) and biases shaped (out,).
    """
    ws0, bs0, ws1, bs1, wh0, bh0, wh1, bh1 = params
    w0 = jnp.concatenate([ws0, wh0], axis=0).astype(dtype)          # (2*nc, nc)
    b0 = jnp.concatenate([bs0, bh0], axis=0)[:, None].astype(jnp.float32)
    bs1p = (bs1 + 1.0)[:, None].astype(jnp.float32)                 # fold the +1
    bh1c = bh1[:, None].astype(jnp.float32)
    return (w0, b0, ws1.astype(dtype), bs1p, wh1.astype(dtype), bh1c)


def sft_layer(feat_nchw, cond_nchw, params, *, dtype=None, t_hw_cap=2048):
    """feat: (N, n_feat, H, W), cond: (N, n_cond, H, W) -> same shape as feat."""
    N, n_feat, H, W = feat_nchw.shape
    _, n_cond, _, _ = cond_nchw.shape
    HW = H * W
    io_dtype = dtype if dtype is not None else feat_nchw.dtype

    # NCHW -> (N, C, H*W): pure reshape, no transpose / extra HBM pass.
    feat3 = feat_nchw.astype(io_dtype).reshape(N, n_feat, HW)
    cond3 = cond_nchw.astype(io_dtype).reshape(N, n_cond, HW)

    w0, b0, ws1, bs1p, wh1, bh1 = pack_params(params, dtype=io_dtype)

    t_hw = _pick_t_hw(HW, cap=t_hw_cap)
    grid = (N, pl.cdiv(HW, t_hw))

    full = lambda shape: pl.BlockSpec(shape, lambda n, p: (0, 0))
    kernel = functools.partial(_sft_kernel, n_cond=n_cond)

    out3 = pl.pallas_call(
        kernel,
        out_shape=jax.ShapeDtypeStruct((N, n_feat, HW), io_dtype),
        grid_spec=pltpu.PrefetchScalarGridSpec(
            num_scalar_prefetch=0,
            grid=grid,
            in_specs=[
                pl.BlockSpec((None, n_feat, t_hw), lambda n, p: (n, 0, p)),  # feat
                pl.BlockSpec((None, n_cond, t_hw), lambda n, p: (n, 0, p)),  # cond
                full((2 * n_cond, n_cond)), full((2 * n_cond, 1)),           # fused conv0
                full((n_feat, n_cond)), full((n_feat, 1)),                   # scale conv1
                full((n_feat, n_cond)), full((n_feat, 1)),                   # shift conv1
            ],
            out_specs=pl.BlockSpec((None, n_feat, t_hw), lambda n, p: (n, 0, p)),
        ),
        compiler_params=pltpu.CompilerParams(
            dimension_semantics=("parallel", "parallel")),
    )(feat3, cond3, w0, b0, ws1, bs1p, wh1, bh1)

    return out3.reshape(N, n_feat, H, W)


# ----------------------------------------------------------------------------
# Params + pure-JAX reference
# ----------------------------------------------------------------------------
def init_params(key, n_feat, n_cond):
    """Conv weights as (out, in) (torch (out,in,1,1) squeezed), biases as (out,)."""
    ks = jax.random.split(key, 8)
    w = lambda k, cout, cin: jax.random.normal(k, (cout, cin), jnp.float32) * 0.1
    b = lambda k, cout: jax.random.normal(k, (cout,), jnp.float32) * 0.1
    ws0, bs0 = w(ks[0], n_cond, n_cond), b(ks[1], n_cond)
    ws1, bs1 = w(ks[2], n_feat, n_cond), b(ks[3], n_feat)
    wh0, bh0 = w(ks[4], n_cond, n_cond), b(ks[5], n_cond)
    wh1, bh1 = w(ks[6], n_feat, n_cond), b(ks[7], n_feat)
    return (ws0, bs0, ws1, bs1, wh0, bh0, wh1, bh1)


def sft_reference(feat, cond, params):
    """Pure-JAX reference matching the PyTorch semantics (leaky_relu slope 0.1)."""
    ws0, bs0, ws1, bs1, wh0, bh0, wh1, bh1 = params
    c = jnp.transpose(cond, (0, 2, 3, 1))   # NHWC
    f = jnp.transpose(feat, (0, 2, 3, 1))
    conv = lambda x, w, b: x @ w.T + b
    s = conv(c, ws0, bs0)
    s = jnp.where(s >= 0, s, 0.1 * s)
    scale = conv(s, ws1, bs1)
    h = conv(c, wh0, bh0)
    h = jnp.where(h >= 0, h, 0.1 * h)
    shift = conv(h, wh1, bh1)
    out = f * (scale + 1.0) + shift
    return jnp.transpose(out, (0, 3, 1, 2))


if __name__ == "__main__":
    key = jax.random.PRNGKey(0)
    k_feat, k_cond, k_params = jax.random.split(key, 3)

    N, n_feat, n_cond, H, W = 2, 32, 16, 16, 16
    feat = jax.random.normal(k_feat, (N, n_feat, H, W), jnp.float32)
    cond = jax.random.normal(k_cond, (N, n_cond, H, W), jnp.float32)
    params = init_params(k_params, n_feat, n_cond)

    ref = sft_reference(feat, cond, params)

    # f32 I/O path — tight check.
    out = sft_layer(feat, cond, params)
    out = jax.block_until_ready(out)
    assert out.shape == (N, n_feat, H, W)
    assert jnp.allclose(out, ref, atol=1e-4, rtol=1e-4)

    # bf16 I/O path (halves HBM traffic; f32 MXU accumulation) — loose check.
    out_bf16 = sft_layer(feat, cond, params, dtype=jnp.bfloat16)
    out_bf16 = jax.block_until_ready(out_bf16)
    assert jnp.allclose(out_bf16.astype(jnp.float32), ref, atol=1e-1, rtol=1e-1)

    print("KERNEL_OK")
</pallas_src>

<mosaic_0001>
module attributes {stable_mosaic.version = 11 : i64} {
  func.func @_sft_kernel(%arg0: i32, %arg1: i32, %arg2: memref<1x32x256xf32, #tpu.memory_space<vmem>>, %arg3: memref<1x16x256xf32, #tpu.memory_space<vmem>>, %arg4: memref<32x16xf32, #tpu.memory_space<vmem>>, %arg5: memref<32x1xf32, #tpu.memory_space<vmem>>, %arg6: memref<32x16xf32, #tpu.memory_space<vmem>>, %arg7: memref<32x1xf32, #tpu.memory_space<vmem>>, %arg8: memref<32x16xf32, #tpu.memory_space<vmem>>, %arg9: memref<32x1xf32, #tpu.memory_space<vmem>>, %arg10: memref<1x32x256xf32, #tpu.memory_space<vmem>>) attributes {dimension_semantics = [#tpu.dimension_semantics<parallel>, #tpu.dimension_semantics<parallel>], iteration_bounds = array<i64: 2, 1>, scalar_prefetch = 0 : i64, scratch_operands = 0 : i64, tpu.core_type = #tpu.core_type<tc>, window_params = [{transform_indices = @transform_0, window_bounds = array<i64: 1, 32, 256>}, {transform_indices = @transform_1, window_bounds = array<i64: 1, 16, 256>}, {pipeline_mode = #tpu.pipeline_mode<synchronous>, transform_indices = @transform_2, window_bounds = array<i64: 32, 16>}, {pipeline_mode = #tpu.pipeline_mode<synchronous>, transform_indices = @transform_3, window_bounds = array<i64: 32, 1>}, {pipeline_mode = #tpu.pipeline_mode<synchronous>, transform_indices = @transform_4, window_bounds = array<i64: 32, 16>}, {pipeline_mode = #tpu.pipeline_mode<synchronous>, transform_indices = @transform_5, window_bounds = array<i64: 32, 1>}, {pipeline_mode = #tpu.pipeline_mode<synchronous>, transform_indices = @transform_6, window_bounds = array<i64: 32, 16>}, {pipeline_mode = #tpu.pipeline_mode<synchronous>, transform_indices = @transform_7, window_bounds = array<i64: 32, 1>}, {transform_indices = @transform_8, window_bounds = array<i64: 1, 32, 256>}]} {
    %c0 = arith.constant 0 : index
    %c0_0 = arith.constant 0 : index
    %c0_1 = arith.constant 0 : index
    %0 = vector.load %arg3[%c0, %c0_0, %c0_1] : memref<1x16x256xf32, #tpu.memory_space<vmem>>, vector<1x16x256xf32>
    %1 = vector.shape_cast %0 : vector<1x16x256xf32> to vector<16x256xf32>
    %c0_2 = arith.constant 0 : index
    %c0_3 = arith.constant 0 : index
    %c0_4 = arith.constant 0 : index
    %2 = vector.load %arg2[%c0_2, %c0_3, %c0_4] : memref<1x32x256xf32, #tpu.memory_space<vmem>>, vector<1x32x256xf32>
    %3 = vector.shape_cast %2 : vector<1x32x256xf32> to vector<32x256xf32>
    %c0_5 = arith.constant 0 : index
    %c0_6 = arith.constant 0 : index
    %4 = vector.load %arg4[%c0_5, %c0_6] : memref<32x16xf32, #tpu.memory_space<vmem>>, vector<32x16xf32>
    %cst = arith.constant dense<0.000000e+00> : vector<32x256xf32>
    %5 = tpu.matmul %4, %1, %cst {dimension_numbers = #tpu.dot_dimension_numbers<[1], [0], [0], [1], [0, 0, 1, 1], [], []>} : vector<32x16xf32>, vector<16x256xf32>, vector<32x256xf32> -> vector<32x256xf32>
    %c0_7 = arith.constant 0 : index
    %c0_8 = arith.constant 0 : index
    %6 = vector.load %arg5[%c0_7, %c0_8] : memref<32x1xf32, #tpu.memory_space<vmem>>, vector<32x1xf32>
    %7 = vector.broadcast %6 : vector<32x1xf32> to vector<32x256xf32>
    %8 = arith.addf %5, %7 : vector<32x256xf32>
    %cst_9 = arith.constant 0.000000e+00 : f32
    %9 = vector.broadcast %cst_9 : f32 to vector<32x256xf32>
    %10 = arith.cmpf oge, %8, %9 : vector<32x256xf32>
    %cst_10 = arith.constant 1.000000e-01 : f32
    %11 = vector.broadcast %cst_10 : f32 to vector<32x256xf32>
    %12 = arith.mulf %11, %8 : vector<32x256xf32>
    %13 = arith.select %10, %8, %12 : vector<32x256xi1>, vector<32x256xf32>
    %14 = vector.extract_strided_slice %13 {offsets = [0, 0], sizes = [16, 256], strides = [1, 1]} : vector<32x256xf32> to vector<16x256xf32>
    %15 = vector.extract_strided_slice %13 {offsets = [16, 0], sizes = [16, 256], strides = [1, 1]} : vector<32x256xf32> to vector<16x256xf32>
    %c0_11 = arith.constant 0 : index
    %c0_12 = arith.constant 0 : index
    %16 = vector.load %arg6[%c0_11, %c0_12] : memref<32x16xf32, #tpu.memory_space<vmem>>, vector<32x16xf32>
    %cst_13 = arith.constant dense<0.000000e+00> : vector<32x256xf32>
    %17 = tpu.matmul %16, %14, %cst_13 {dimension_numbers = #tpu.dot_dimension_numbers<[1], [0], [0], [1], [0, 0, 1, 1], [], []>} : vector<32x16xf32>, vector<16x256xf32>, vector<32x256xf32> -> vector<32x256xf32>
    %c0_14 = arith.constant 0 : index
    %c0_15 = arith.constant 0 : index
    %18 = vector.load %arg7[%c0_14, %c0_15] : memref<32x1xf32, #tpu.memory_space<vmem>>, vector<32x1xf32>
    %19 = vector.broadcast %18 : vector<32x1xf32> to vector<32x256xf32>
    %20 = arith.addf %17, %19 : vector<32x256xf32>
    %c0_16 = arith.constant 0 : index
    %c0_17 = arith.constant 0 : index
    %21 = vector.load %arg8[%c0_16, %c0_17] : memref<32x16xf32, #tpu.memory_space<vmem>>, vector<32x16xf32>
    %cst_18 = arith.constant dense<0.000000e+00> : vector<32x256xf32>
    %22 = tpu.matmul %21, %15, %cst_18 {dimension_numbers = #tpu.dot_dimension_numbers<[1], [0], [0], [1], [0, 0, 1, 1], [], []>} : vector<32x16xf32>, vector<16x256xf32>, vector<32x256xf32> -> vector<32x256xf32>
    %c0_19 = arith.constant 0 : index
    %c0_20 = arith.constant 0 : index
    %23 = vector.load %arg9[%c0_19, %c0_20] : memref<32x1xf32, #tpu.memory_space<vmem>>, vector<32x1xf32>
    %24 = vector.broadcast %23 : vector<32x1xf32> to vector<32x256xf32>
    %25 = arith.addf %22, %24 : vector<32x256xf32>
    %26 = arith.mulf %3, %20 : vector<32x256xf32>
    %27 = arith.addf %26, %25 : vector<32x256xf32>
    %c0_21 = arith.constant 0 : index
    %c0_22 = arith.constant 0 : index
    %c0_23 = arith.constant 0 : index
    %28 = vector.load %arg10[%c0_21, %c0_22, %c0_23] : memref<1x32x256xf32, #tpu.memory_space<vmem>>, vector<1x32x256xf32>
    %29 = vector.shape_cast %28 : vector<1x32x256xf32> to vector<32x256xf32>
    %30 = vector.shape_cast %27 : vector<32x256xf32> to vector<1x32x256xf32>
    tpu.vector_store %arg10[%c0_21, %c0_22, %c0_23], %30 {strides = array<i32>} : memref<1x32x256xf32, #tpu.memory_space<vmem>>, vector<1x32x256xf32>,
    return
  }
  func.func @transform_0(%arg0: i32, %arg1: i32) -> (i32, i32, i32) {
    %c0_i32 = arith.constant 0 : i32
    %c0_i32_0 = arith.constant 0 : i32
    return %arg0, %c0_i32, %arg1 : i32, i32, i32
  }
  func.func @transform_1(%arg0: i32, %arg1: i32) -> (i32, i32, i32) {
    %c0_i32 = arith.constant 0 : i32
    %c0_i32_0 = arith.constant 0 : i32
    return %arg0, %c0_i32, %arg1 : i32, i32, i32
  }
  func.func @transform_2(%arg0: i32, %arg1: i32) -> (i32, i32) {
    %c0_i32 = arith.constant 0 : i32
    %c0_i32_0 = arith.constant 0 : i32
    %c0_i32_1 = arith.constant 0 : i32
    return %c0_i32, %c0_i32_0 : i32, i32
  }
  func.func @transform_3(%arg0: i32, %arg1: i32) -> (i32, i32) {
    %c0_i32 = arith.constant 0 : i32
    %c0_i32_0 = arith.constant 0 : i32
    %c0_i32_1 = arith.constant 0 : i32
    return %c0_i32, %c0_i32_0 : i32, i32
  }
  func.func @transform_4(%arg0: i32, %arg1: i32) -> (i32, i32) {
    %c0_i32 = arith.constant 0 : i32
    %c0_i32_0 = arith.constant 0 : i32
    %c0_i32_1 = arith.constant 0 : i32
    return %c0_i32, %c0_i32_0 : i32, i32
  }
  func.func @transform_5(%arg0: i32, %arg1: i32) -> (i32, i32) {
    %c0_i32 = arith.constant 0 : i32
    %c0_i32_0 = arith.constant 0 : i32
    %c0_i32_1 = arith.constant 0 : i32
    return %c0_i32, %c0_i32_0 : i32, i32
  }
  func.func @transform_6(%arg0: i32, %arg1: i32) -> (i32, i32) {
    %c0_i32 = arith.constant 0 : i32
    %c0_i32_0 = arith.constant 0 : i32
    %c0_i32_1 = arith.constant 0 : i32
    return %c0_i32, %c0_i32_0 : i32, i32
  }
  func.func @transform_7(%arg0: i32, %arg1: i32) -> (i32, i32) {
    %c0_i32 = arith.constant 0 : i32
    %c0_i32_0 = arith.constant 0 : i32
    %c0_i32_1 = arith.constant 0 : i32
    return %c0_i32, %c0_i32_0 : i32, i32
  }
  func.func @transform_8(%arg0: i32, %arg1: i32) -> (i32, i32, i32) {
    %c0_i32 = arith.constant 0 : i32
    %c0_i32_0 = arith.constant 0 : i32
    return %arg0, %c0_i32, %arg1 : i32, i32, i32
  }
}

</mosaic_0001>

<bundles_post_ra>
// kernel: tpu_custom_call.1
= control target key start
LH: loop header
LB: loop body
LE: loop exit
PB: predicated region body
PF: predicated region fallthrough
CT: control target
= control target key end

     0   :  { %13 = vsyncpa [#allocation3], 0  ;;  %s1388_s0 = inlined_call_operand.hbm [shape: f32[2,32,256], index: 0, kind: input, shape index: {}]   ;;  %s1389_s1 = inlined_call_operand.vmem [shape: f32[2,16,256], index: 1, kind: input, shape index: {}]   ;;  %s1390_s2 = inlined_call_operand.vmem [shape: f32[32,16], index: 2, kind: input, shape index: {}]   ;;  %s1391_s3 = inlined_call_operand.vmem [shape: f32[32,1], index: 3, kind: input, shape index: {}]   ;;  %s1392_s4 = inlined_call_operand.vmem [shape: f32[32,16], index: 4, kind: input, shape index: {}]   ;;  %s1393_s5 = inlined_call_operand.vmem [shape: f32[32,1], index: 5, kind: input, shape index: {}]   ;;  %s1394_s6 = inlined_call_operand.vmem [shape: f32[32,16], index: 6, kind: input, shape index: {}]   ;;  %s1395_s7 = inlined_call_operand.vmem [shape: f32[32,1], index: 7, kind: input, shape index: {}]   ;;  %s1396_s8 = inlined_call_operand.hbm [shape: f32[2,32,256], index: 8, kind: output, shape index: {}]  }
   0x1   :  { %15 = vsyncpa [#allocation3 + $0x1], 0 }
   0x2   :  { %16 = vsyncpa [#allocation4], 0 }
   0x3   :  { %18 = vsyncpa [#allocation4 + $0x1], 0  ;;  %s1142_s27 = smov 0   ;;  %s1144_s28 = smov 0  }
   0x4   :  { %s1146_s29 = smov 0   ;;  %s1148_s30 = smov 0  }
   0x5   :  { %s1150_s9 = smov 0   ;;  %s1152_s10 = smov 0  }
   0x6 LB: > { %1399 = sst [smem:[#allocation8_spill]] %s1086_s9  ;;  %s860_s11 = sadd.s32 4294967295, %s1090_s10   ;;  %s1090_s10 = sphi %s1152_s10, %s24_s10   ;;  %s1086_s9 = sphi %s1150_s9, %s1408_s9   ;;  %s1082_s30 = sphi %s1148_s30, %s1407_s30   ;;  %s1078_s29 = sphi %s1146_s29, %s1411_s29   ;;  %s1074_s28 = sphi %s1144_s28, %s1410_s28   ;;  %s1070_s27 = sphi %s1142_s27, %s1409_s27  }
   0x7   : > { %s861_s12 = sadd.s32 4294967294, %s1090_s10   ;;  %s36_s13 = sadd.s32 1, %s1086_s9 }
   0x8   : > { %s45_s14 = sadd.s32 1, %s1078_s29  ;;  %p38_p0 = scmp.ge.s32.totalorder %s36_s13, 2 }
   0x9   : > { %p52_p1 = scmp.ne.s32.totalorder %s1078_s29, %s1074_s28  ;;  %p53_p2 = scmp.eq.s32.totalorder %s1090_s10, 0 }
   0xa   : > { %p58_p3 = scmp.ne.s32.totalorder %s1074_s28, %s1070_s27  ;;  %s1413_s13 = smov (%p38_p0, %s36_s13), 0 }
   0xb   : > { %1400 = sst [smem:[#allocation9_spill]] %s1413_s13  ;;  %p1183_p4 = por %p53_p2, %p52_p1 }
   0xc   : > { %p59_p5 = scmp.eq.s32.totalorder %s860_s11, 0  ;;  %s40_s16 = ssub.s32 %s1086_s9, %s1413_s13 }
   0xd   : > { %p238_p6 = scmp.eq.s32.totalorder %s860_s11, 1  ;;  %p43_p7 = scmp.eq.s32.totalorder %s40_s16, 0 }
   0xe   : > { %p1189_p8 = por %p59_p5, %p58_p3  ;;  %p244_p10 = scmp.eq.s32.totalorder %s861_s12, 1 }
   0xf   : > { %p1193_p9 = por %p238_p6, %p52_p1  ;;  %p863_p12 = scmp.ge.s32.totalorder %s1090_s10, 2 }
  0x10   : > { %s1198_s19 = scalar_select %p43_p7, %s1078_s29, %s45_s14  }
  0x11   : > { %p1200_p11 = por %p244_p10, %p58_p3  ;;  %p920_p13 = scmp.lt.s32.totalorder %s1090_s10, 2 }
  0x12   : > { %1404 = sst [smem:[#allocation10_spill]] %s1198_s19  ;;  %s282_s21 = sand.u32 1, %s1078_s29  }
  0x13   : > { %s864_s22 = sshll.u32 %s282_s21, 6  ;;  %s901_s23 = sshll.u32 %s1086_s9, 6 }
  0x14   : > { %s293_s26 = scalar_lea.hbm %s1388_s0, %s901_s23  ;;  %s286_s11 = scalar_lea.vmem [#allocation2], %s864_s22 }
  0x15   : > { %s296_s16 = sshll.u32 %s286_s11, 4  ;;  %s294_s13 = sshll.u32 %s293_s26, 4  ;;  %s297_s16 = int_to_ptr.vmem [resolvable:$true] %s296_s16  ;;  %s295_s13 = int_to_ptr.hbm [resolvable:$true] %s294_s13 }
  0x16   : > { %p913_p0 = pnand %p920_p13, %p1183_p4  ;;  %p867_p1 = scmp.ge.s32.totalorder %s1090_s10, 1 }
  0x17   : > { %s283_s12 = scalar_lea.sflag [#allocation3], %s282_s21  ;;  %s1092_s14 = smov 256  }
  0x18   : > { %s1093_s19 = smov 16   ;;  %p317_p2 = scmp.lt.s32.totalorder %s1090_s10, 3 }
  0x19   : > { %915 = dma.hbm_to_vmem [thread:$0]  (!%p913_p0), %s295_s13, 1024, %s297_s16, %s283_s12, %s1092_s14, %s1092_s14, %s1093_s19  }
  0x1a   : > { %p318_p3 = pnand %p867_p1, %p317_p2 }
  0x1b   : > { %s1216_s9 = sand.u32 (!%p318_p3), 1, %s1074_s28  }
  0x1c   : > { %321 = sbr.rel (%p318_p3) target bundleno = 354 (0x162), region = 52  ;;  %s868_s22 = sshll.u32 (!%p318_p3), %s1216_s9, 6 }
  0x1d   : > { %s324_s23 = scalar_lea.sflag (!%p318_p3), [#allocation3], %s1216_s9  ;;  %s1222_s15 = scalar_lea.vmem (!%p318_p3), [#allocation2], %s868_s22 }
  0x21   : > { %1061 = dma.done.wait (%p1189_p8), %s324_s23, 1024  }
  0x22   : > { %1063 = vsyncadd (%p1189_p8), %s324_s23, 4294966272  ;;  %p372_p4 = scmp.lt.s32.totalorder %s1082_s30, 1  ;;  %v1094_v0 = vmov 0   ;;  %v399_v1 = vld [vmem:[%s1391_s3 + $0x8] sm:$0xff]  ;;  %v394_v6 = vld [vmem:[%s1390_s2] sm:$0xff]  ;;  %vm422_vm0 = vcmask 130048  }
  0x23   : > { %975 = vset.pattern.permute.xlu0 %v1094_v0  ;;  %976 = vset.pattern.permute.xlu1 %v1094_v0  ;;  %v396_v7 = vld [vmem:[%s1390_s2 + $0x10] sm:$0xff]  ;;  %v401_v8 = vld [vmem:[%s1391_s3 + $0x18] sm:$0xff]  ;;  %v398_v9 = vld [vmem:[%s1391_s3] sm:$0xff]  ;;  %s1333_s26 = scalar_lea.vmem [#allocation5], %s868_s22  ;;  %s903_s22 = sshll.u32 %s1082_s30, 6 }
  0x24   : > { %s373_s13 = scalar_select %p372_p4, %s1082_s30, 1  ;;  %977 = vset.pattern.permute.xlu2 %v1094_v0  ;;  %409 = vperm.xlu0 %975, %v399_v1   ;;  %v395_v10 = vld [vmem:[%s1390_s2 + $0x8] sm:$0xff]  ;;  %v397_v11 = vld [vmem:[%s1390_s2 + $0x18] sm:$0xff]  ;;  %v400_v12 = vld [vmem:[%s1391_s3 + $0x10] sm:$0xff] }
  0x25   : > { %419 = vperm.xlu1 %976, %v401_v8   ;;  %v523_v13 = vld [vmem:[%s1393_s5 + $0x10] sm:$0xff]  ;;  %v524_v14 = vld [vmem:[%s1393_s5 + $0x18] sm:$0xff]  ;;  %v620_v15 = vld [vmem:[%s1395_s7 + $0x8] sm:$0xff]  ;;  %s751_s16 = scalar_lea.hbm %s1396_s8, %s903_s22  ;;  %s752_s30 = sshll.u32 %s1333_s26, 4  ;;  %s753_s30 = int_to_ptr.vmem [resolvable:$true] %s752_s30 }
  0x26   : > { %s902_s19 = sshll.u32 %s373_s13, 5  ;;  %v621_v16 = vld [vmem:[%s1395_s7 + $0x10] sm:$0xff]  ;;  %v521_v27 = vld [vmem:[%s1393_s5] sm:$0xff]  ;;  %v522_v46 = vld [vmem:[%s1393_s5 + $0x8] sm:$0xff]  ;;  %s754_s12 = sshll.u32 %s751_s16, 4  ;;  %s755_s12 = int_to_ptr.hbm [resolvable:$true] %s754_s12 }
  0x27   : > { %s379_s25 = scalar_lea.vmem %s1389_s1, %s902_s19  ;;  %527 = vperm.xlu2 %977, %v521_v27   ;;  %v517_v39 = vld [vmem:[%s1392_s4] sm:$0xff]  ;;  %v518_v56 = vld [vmem:[%s1392_s4 + $0x8] sm:$0xff]  ;;  %v519_v60 = vld [vmem:[%s1392_s4 + $0x10] sm:$0xff]  ;;  %s1022_s14 = sshra.s32 %s755_s12, 4  ;;  %s1023_s14 = int_to_ptr.hbm [resolvable:$true] %s1022_s14 }
  0x28   : > { %v384_v2 = vld [vmem:[%s379_s25 + $0x10] sm:$0xff]  ;;  %v385_v3 = vld [vmem:[%s379_s25 + $0x18] sm:$0xff]  ;;  %v382_v4 = vld [vmem:[%s379_s25] sm:$0xff]  ;;  %s1024_s23 = scalar_lea.hbm %s1023_s14, 64  ;;  %s1028_s21 = scalar_lea.hbm %s1396_s8, 128 }
  0x29   : > { %449 = vmatpush.msra.mxu0 %v384_v2  ;;  %v383_v5 = vld [vmem:[%s379_s25 + $0x8] sm:$0xff]  ;;  %904 = vmatpush.msra.mxu2 %v384_v2  ;;  %v615_v54 = vld [vmem:[%s1394_s6] sm:$0xff]  ;;  %v622_v61 = vld [vmem:[%s1395_s7 + $0x18] sm:$0xff]  ;;  %p1025_p5 = scmp.ne.s32.totalorder %s1023_s14, %s1024_s23  ;;  %p1029_p8 = scmp.lt.s32.totalorder %s1023_s14, %s1396_s8 }
  0x2a   : > { %478 = vmatpush.msra.mxu1 %v385_v3  ;;  %906 = vmatpush.msra.mxu3 %v385_v3  ;;  %v619_v58 = vld [vmem:[%s1395_s7] sm:$0xff]  ;;  %v616_v59 = vld [vmem:[%s1394_s6 + $0x8] sm:$0xff]  ;;  %v617_v62 = vld [vmem:[%s1394_s6 + $0x10] sm:$0xff]  ;;  %p1030_p10 = scmp.lt.s32.totalorder %s1028_s21, %s1024_s23 }
  0x2b   : > { %450 = vmatpush.msra.mxu0 %v382_v4  ;;  %905 = vmatpush.msra.mxu2 %v382_v4  ;;  %v520_v63 = vld [vmem:[%s1392_s4 + $0x18] sm:$0xff]  ;;  %v386_v4 = vld [vmem:[%s1222_s15] sm:$0xff]  ;;  %v387_v8 = vld [vmem:[%s1222_s15 + $0x8] sm:$0xff]  ;;  %p1026_p6 = pnand %p1025_p5, %p1193_p9 }
  0x2c   : > { %479 = vmatpush.msra.mxu1 %v383_v5  ;;  %907 = vmatpush.msra.mxu3 %v383_v5  ;;  %v618_v0 = vld [vmem:[%s1394_s6 + $0x18] sm:$0xff]  ;;  %p1031_p13 = por %p1030_p10, %p1029_p8 }
  0x2d   : > { %872 = vmatmul.msk.f32.vlgmr.msra.gmra.mxu0 %vm422_vm0, %v394_v6  ;;  %874 = vmatmul.msk.f32.vlgmr.msra.gmra.mxu2 %vm422_vm0, %v396_v7  ;;  %p1027_p7 = pneg %p1026_p6 }
  0x2e   : > { %876 = vmatmul.msk.f32.vlgmr.msra.gmra.mxu1 %vm422_vm0, %v394_v6  ;;  %878 = vmatmul.msk.f32.vlgmr.msra.gmra.mxu3 %vm422_vm0, %v396_v7 }
  0x2f   : > { %404 = vperm.xlu0 %975, %v398_v9   ;;  %414 = vperm.xlu1 %976, %v400_v12   ;;  %p1032_p0 = pnand %p1031_p13, %p1027_p7 }
  0x30   : > { %532 = vperm.xlu2 %977, %v522_v46  }
  0x35   : > { %873 = vmatmul.msk.f32.gmra.mxu0 %vm422_vm0, %v395_v10  ;;  %875 = vmatmul.msk.f32.gmra.mxu2 %vm422_vm0, %v397_v11 }
  0x36   : > { %877 = vmatmul.msk.f32.gmra.mxu1 %vm422_vm0, %v395_v10  ;;  %879 = vmatmul.msk.f32.gmra.mxu3 %vm422_vm0, %v397_v11 }
  0x37   : > { %537 = vperm.xlu0 %975, %v523_v13   ;;  %542 = vperm.xlu1 %976, %v524_v14  }
  0x38   : > { %625 = vperm.xlu2 %977, %v619_v58  }
  0x3f   : > { %630 = vperm.xlu0 %975, %v620_v15   ;;  %635 = vperm.xlu1 %976, %v621_v16  }
  0x40   : > { %640 = vperm.xlu2 %977, %v622_v61  }
  0x81   : > { %v528_v1 = vpop.permute.xlu2 %527 }
  0x8a   : > { %v533_v2 = vpop.permute.xlu2 %532 }
  0x92   : > { %v626_v6 = vpop.permute.xlu2 %625 }
  0x96   : > { %v410_v17 = vpop.permute.xlu0 %409 }
  0x97   : > { %v420_v20 = vpop.permute.xlu1 %419 }
  0xa1   : > { %v405_v21 = vpop.permute.xlu0 %404  ;;  %v415_v35 = vpop.permute.xlu1 %414 }
  0xa9   : > { %v538_v3 = vpop.permute.xlu0 %537 }
  0xaa   : > { %v452_v18 = vpop.f32.mrf.mxu0 }
  0xab   : > { %v481_v19 = vpop.f32.mrf.mxu1  ;;  %v453_v22 = vadd.f32 %v452_v18, %v405_v21 }
  0xac   : > { %v482_v24 = vadd.f32 %v481_v19, %v405_v21  ;;  %v543_v19 = vpop.permute.xlu1 %542 }
  0xad   : > { %v501_v32 = vmul.f32 0.1, %v453_v22  ;;  %vm493_vm3 = vcmp.ge.f32.partialorder %v453_v22, 0.0 }
  0xae   : > { %v502_v34 = vmul.f32 0.1, %v482_v24  ;;  %vm494_vm4 = vcmp.ge.f32.partialorder %v482_v24, 0.0 }
  0xaf   : > { %v509_v42 = vsel %vm493_vm3, %v453_v22, %v501_v32 }
  0xb0   : > { %v458_v23 = vpop.f32.mrf.mxu2  ;;  %v510_v45 = vsel %vm494_vm4, %v482_v24, %v502_v34 }
  0xb1   : > { %v487_v25 = vpop.f32.mrf.mxu3  ;;  %v459_v37 = vadd.f32 %v458_v23, %v415_v35  ;;  %v389_v23 = vld [vmem:[%s1222_s15 + $0x18] sm:$0xff] }
  0xb2   : > { %v455_v26 = vpop.f32.mrf.mxu0  ;;  %v488_v40 = vadd.f32 %v487_v25, %v415_v35  ;;  %v390_v35 = vld [vmem:[%s1222_s15 + $0x20] sm:$0xff] }
  0xb3   : > { %v456_v28 = vadd.f32 %v455_v26, %v410_v17  ;;  %v484_v29 = vpop.f32.mrf.mxu1  ;;  %v505_v49 = vmul.f32 0.1, %v459_v37  ;;  %vm497_vm7 = vcmp.ge.f32.partialorder %v459_v37, 0.0  ;;  %v631_v26 = vpop.permute.xlu0 %630 }
  0xb4   : > { %v485_v30 = vadd.f32 %v484_v29, %v410_v17  ;;  %v506_v51 = vmul.f32 0.1, %v488_v40  ;;  %vm498_vm8 = vcmp.ge.f32.partialorder %v488_v40, 0.0 }
  0xb5   : > { %vm495_vm1 = vcmp.ge.f32.partialorder %v456_v28, 0.0  ;;  %v503_v31 = vmul.f32 0.1, %v456_v28  ;;  %v513_v55 = vsel %vm497_vm7, %v459_v37, %v505_v49 }
  0xb6   : > { %vm496_vm2 = vcmp.ge.f32.partialorder %v485_v30, 0.0  ;;  %v504_v33 = vmul.f32 0.1, %v485_v30  ;;  %v514_v57 = vsel %vm498_vm8, %v488_v40, %v506_v51 }
  0xb7   : > { %v511_v36 = vsel %vm495_vm1, %v456_v28, %v503_v31 }
  0xb8   : > { %571 = vmatpush.msrb.mxu2 %v511_v36  ;;  %v512_v38 = vsel %vm496_vm2, %v485_v30, %v504_v33  ;;  %v461_v41 = vpop.f32.mrf.mxu2 }
  0xb9   : > { %600 = vmatpush.msrb.mxu3 %v512_v38  ;;  %v462_v43 = vadd.f32 %v461_v41, %v420_v20  ;;  %v490_v44 = vpop.f32.mrf.mxu3  ;;  %v391_v38 = vld [vmem:[%s1222_s15 + $0x28] sm:$0xff]  ;;  %v636_v41 = vpop.permute.xlu1 %635 }
  0xba   : > { %572 = vmatpush.msrb.mxu2 %v509_v42  ;;  %v491_v47 = vadd.f32 %v490_v44, %v420_v20  ;;  %v388_v20 = vld [vmem:[%s1222_s15 + $0x10] sm:$0xff] }
  0xbb   : > { %601 = vmatpush.msrb.mxu3 %v510_v45  ;;  %880 = vmatmul.msk.f32.vlgmr.msrb.gmra.mxu2 %vm422_vm0, %v517_v39  ;;  %vm499_vm5 = vcmp.ge.f32.partialorder %v462_v43, 0.0  ;;  %v507_v48 = vmul.f32 0.1, %v462_v43 }
  0xbc   : > { %884 = vmatmul.msk.f32.vlgmr.msrb.gmra.mxu3 %vm422_vm0, %v517_v39  ;;  %vm500_vm6 = vcmp.ge.f32.partialorder %v491_v47, 0.0  ;;  %v508_v50 = vmul.f32 0.1, %v491_v47 }
  0xbd   : > { %v515_v52 = vsel %vm499_vm5, %v462_v43, %v507_v48 }
  0xbe   : > { %669 = vmatpush.msrb.mxu0 %v515_v52  ;;  %v516_v53 = vsel %vm500_vm6, %v491_v47, %v508_v50  ;;  %v392_v50 = vld [vmem:[%s1222_s15 + $0x30] sm:$0xff] }
  0xbf   : > { %698 = vmatpush.msrb.mxu1 %v516_v53  ;;  %v393_v53 = vld [vmem:[%s1222_s15 + $0x38] sm:$0xff]  ;;  %s738_s15 = scalar_lea.sflag [#allocation4], %s1216_s9 }
  0xc0   : > { %670 = vmatpush.msrb.mxu0 %v513_v55 }
  0xc1   : > { %699 = vmatpush.msrb.mxu1 %v514_v57  ;;  %888 = vmatmul.msk.f32.vlgmr.msrb.gmra.mxu0 %vm422_vm0, %v615_v54 }
  0xc2   : > { %892 = vmatmul.msk.f32.vlgmr.msrb.gmra.mxu1 %vm422_vm0, %v615_v54 }
  0xc3   : > { %881 = vmatmul.msk.f32.gmra.mxu2 %vm422_vm0, %v518_v56 }
  0xc4   : > { %885 = vmatmul.msk.f32.gmra.mxu3 %vm422_vm0, %v518_v56  ;;  %v641_v56 = vpop.permute.xlu2 %640 }
  0xc9   : > { %889 = vmatmul.msk.f32.gmra.mxu0 %vm422_vm0, %v616_v59 }
  0xca   : > { %893 = vmatmul.msk.f32.gmra.mxu1 %vm422_vm0, %v616_v59 }
  0xcb   : > { %882 = vmatmul.msk.f32.gmra.mxu2 %vm422_vm0, %v519_v60 }
  0xcc   : > { %886 = vmatmul.msk.f32.gmra.mxu3 %vm422_vm0, %v519_v60 }
  0xd1   : > { %890 = vmatmul.msk.f32.gmra.mxu0 %vm422_vm0, %v617_v62 }
  0xd2   : > { %894 = vmatmul.msk.f32.gmra.mxu1 %vm422_vm0, %v617_v62 }
  0xd3   : > { %883 = vmatmul.msk.f32.gmra.mxu2 %vm422_vm0, %v520_v63 }
  0xd4   : > { %887 = vmatmul.msk.f32.gmra.mxu3 %vm422_vm0, %v520_v63 }
  0xd9   : > { %891 = vmatmul.msk.f32.gmra.mxu0 %vm422_vm0, %v618_v0 }
  0xda   : > { %895 = vmatmul.msk.f32.gmra.mxu1 %vm422_vm0, %v618_v0 }
 0x13e   : > { %v574_v5 = vpop.f32.mrf.mxu2  ;;  %v672_v10 = vpop.f32.mrf.mxu0 }
 0x13f   : > { %v575_v7 = vadd.f32 %v574_v5, %v528_v1  ;;  %v603_v9 = vpop.f32.mrf.mxu3  ;;  %v701_v12 = vpop.f32.mrf.mxu1  ;;  %v673_v13 = vadd.f32 %v672_v10, %v626_v6 }
 0x140   : > { %v604_v11 = vadd.f32 %v603_v9, %v528_v1  ;;  %v702_v15 = vadd.f32 %v701_v12, %v626_v6 }
 0x141   : > { %v713_v14 = vmul.f32 %v575_v7, %v386_v4 }
 0x142   : > { %v714_v16 = vmul.f32 %v604_v11, %v387_v8 }
 0x143   : > { %v721_v17 = vadd.f32 %v713_v14, %v673_v13 }
 0x144   : > { %v722_v18 = vadd.f32 %v714_v16, %v702_v15 }
 0x145   : > { %729 = vst [vmem:[%s1333_s26] sm:$0xff] %v721_v17 }
 0x146   : > { %730 = vst [vmem:[%s1333_s26 + $0x8] sm:$0xff] %v722_v18  ;;  %v577_v21 = vpop.f32.mrf.mxu2  ;;  %v675_v25 = vpop.f32.mrf.mxu0 }
 0x147   : > { %v578_v22 = vadd.f32 %v577_v21, %v533_v2  ;;  %v606_v24 = vpop.f32.mrf.mxu3  ;;  %v704_v28 = vpop.f32.mrf.mxu1  ;;  %v676_v30 = vadd.f32 %v675_v25, %v631_v26 }
 0x148   : > { %v607_v27 = vadd.f32 %v606_v24, %v533_v2  ;;  %v705_v32 = vadd.f32 %v704_v28, %v631_v26 }
 0x149   : > { %v715_v29 = vmul.f32 %v578_v22, %v388_v20 }
 0x14a   : > { %v716_v31 = vmul.f32 %v607_v27, %v389_v23 }
 0x14b   : > { %v723_v33 = vadd.f32 %v715_v29, %v676_v30 }
 0x14c   : > { %v724_v34 = vadd.f32 %v716_v31, %v705_v32 }
 0x14d   : > { %731 = vst [vmem:[%s1333_s26 + $0x10] sm:$0xff] %v723_v33 }
 0x14e   : > { %732 = vst [vmem:[%s1333_s26 + $0x18] sm:$0xff] %v724_v34  ;;  %v580_v36 = vpop.f32.mrf.mxu2  ;;  %v678_v40 = vpop.f32.mrf.mxu0 }
 0x14f   : > { %v581_v37 = vadd.f32 %v580_v36, %v538_v3  ;;  %v609_v39 = vpop.f32.mrf.mxu3  ;;  %v707_v43 = vpop.f32.mrf.mxu1  ;;  %v679_v45 = vadd.f32 %v678_v40, %v636_v41 }
 0x150   : > { %v610_v42 = vadd.f32 %v609_v39, %v538_v3  ;;  %v708_v47 = vadd.f32 %v707_v43, %v636_v41 }
 0x151   : > { %v717_v44 = vmul.f32 %v581_v37, %v390_v35 }
 0x152   : > { %v718_v46 = vmul.f32 %v610_v42, %v391_v38 }
 0x153   : > { %v725_v48 = vadd.f32 %v717_v44, %v679_v45 }
 0x154   : > { %v726_v49 = vadd.f32 %v718_v46, %v708_v47 }
 0x155   : > { %733 = vst [vmem:[%s1333_s26 + $0x20] sm:$0xff] %v725_v48 }
 0x156   : > { %734 = vst [vmem:[%s1333_s26 + $0x28] sm:$0xff] %v726_v49  ;;  %v583_v51 = vpop.f32.mrf.mxu2  ;;  %v681_v55 = vpop.f32.mrf.mxu0 }
 0x157   : > { %v584_v52 = vadd.f32 %v583_v51, %v543_v19  ;;  %v612_v54 = vpop.f32.mrf.mxu3  ;;  %v710_v58 = vpop.f32.mrf.mxu1  ;;  %v682_v60 = vadd.f32 %v681_v55, %v641_v56 }
 0x158   : > { %v613_v57 = vadd.f32 %v612_v54, %v543_v19  ;;  %v711_v62 = vadd.f32 %v710_v58, %v641_v56 }
 0x159   : > { %v719_v59 = vmul.f32 %v584_v52, %v392_v50 }
 0x15a   : > { %v720_v61 = vmul.f32 %v613_v57, %v393_v53 }
 0x15b   : > { %v727_v63 = vadd.f32 %v719_v59, %v682_v60 }
 0x15c   : > { %v728_v0 = vadd.f32 %v720_v61, %v711_v62 }
 0x15d   : > { %735 = vst [vmem:[%s1333_s26 + $0x30] sm:$0xff] %v727_v63 }
 0x15e   : > { %736 = vst [vmem:[%s1333_s26 + $0x38] sm:$0xff] %v728_v0 }
 0x15f   : > { %1035 = shalt.err (!%p1032_p0)
}
 0x160   : > { %s1095_s9 = smov 256   ;;  %s1096_s26 = smov 16  }
 0x161   : > { %910 = dma.vmem_to_hbm [thread:$0]  (%p1193_p9), %s753_s30, 1024, %s755_s12, %s738_s15, %s1095_s9, %s1095_s9, %s1096_s26  }
 0x162 PF: > { %s769_s22 = sand.u32 1, %s1070_s27   ;;  %p917_p1 = pnand %p863_p12, %p1200_p11 }
 0x163   : > { %s770_s11 = scalar_lea.sflag [#allocation4], %s769_s22 }
 0x164   : > { %p918_p2 = pneg %p917_p1 }
 0x166   : > { %1065 = dma.done.wait (%p918_p2), %s770_s11, 1024  }
 0x167   : > { %1067 = vsyncadd (%p918_p2), %s770_s11, 4294966272  ;;  %s24_s10 = sadd.s32 1, %s1090_s10   ;;  %s1406_s17 = sld [smem:[#allocation10_spill]] }
 0x168   : > { %p21_p3 = scmp.ge.s32.totalorder %s24_s10, 4   ;;  %s1407_s30 = sld [smem:[#allocation8_spill]] }
 0x169   : > { %s1408_s9 = sld [smem:[#allocation9_spill]]  ;;  %s1409_s27 = smov %s1074_s28 }
 0x16a   : > { %s1410_s28 = smov %s1078_s29  ;;  %23 = sbr.rel (!%p21_p3) target bundleno = 6 (0x6), region = 100 }
 0x16d   : > { %s1411_s29 = smov %s1406_s17 }
 0x16f   :  { %776 = vsyncpa [#allocation3], 1 }
 0x170   :  { %778 = vsyncpa [#allocation3 + $0x1], 1 }
 0x171   :  { %779 = vsyncpa [#allocation4], 1 }
 0x172   :  { %781 = vsyncpa [#allocation4 + $0x1], 1 }

</bundles_post_ra>
